<compile_context>
chip_gen: v6e
topology: v6e:2x2x1
jax: 0.10.0
libtpu: 0.0.40
codegen_flags: <defaults>
</compile_context>

<pallas_src>
import functools

import numpy as np
import jax
import jax.numpy as jnp
from jax.experimental import pallas as pl
from jax.experimental.pallas import tpu as pltpu


def _copy_cast_kernel(x_ref, o_ref):
    """Identity-transform path: out = float32(x).  Pure streaming cast+copy."""
    o_ref[...] = x_ref[...].astype(o_ref.dtype)


def _masked_transform_kernel(mask_ref, x_ref, o_ref, *, transform_fn):
    """Per-row gated elementwise transform on a (TB, TN) tile.

    mask_ref: VMEM (TB, 1) int32   -- per-row apply/skip gate
    x_ref   : VMEM (TB, TN) input tile (original dtype)
    o_ref   : VMEM (TB, TN) float32 output tile
    """
    x = x_ref[...].astype(jnp.float32)              # in-kernel upcast
    t = transform_fn(x)
    apply = mask_ref[...] != 0                      # (TB,1) -> broadcast lanes
    o_ref[...] = jnp.where(apply, t, x).astype(o_ref.dtype)


def _step_budget_bytes():
    """Per-grid-step (input tile + output tile) byte budget, per generation."""
    budget = 8 * 1024 * 1024                        # v5e / v6e default
    try:
        info = pltpu.get_tpu_info()
        cap = getattr(info, "vmem_capacity_bytes", None)
        # v7x-class: 64 MiB VMEM per TC but ~3.2 TB/s HBM -> bigger steps to
        # amortize the ~0.35us fixed per-step overhead.
        if cap is not None and cap <= 80 * 1024 * 1024:
            budget = 14 * 1024 * 1024
    except Exception:
        pass
    return budget


def _repack_rows(B, N):
    """Find R so (B*R, N//R) tiles are sublane-dense when B < 8.

    Requires N % R == 0 and (N // R) % 128 == 0 (lane-dense rows) so the
    reshape is a free bitcast and stores stay unmasked.  Returns 1 if no such
    factor exists (fall back to full-dim blocks, still legal).
    """
    if B >= 8:
        return 1
    r0 = (8 + B - 1) // B
    for R in range(r0, min(N, 4096) + 1):
        if N % R == 0 and (N // R) % 128 == 0:
            return R
    return 1


def _choose_tiles(rows, cols, in_itemsize, budget_bytes):
    """Pick a (TB, TN) block: sublane-dense rows, lane-dense (or full) cols."""
    per_elem = in_itemsize + 4                      # input elem + f32 out elem
    if rows < 8:
        TB = rows                                   # full dim -> always legal
    else:
        TB = min((rows // 8) * 8, 512)              # multiple of 8
        max_tb = max(8, ((budget_bytes // (128 * per_elem)) // 8) * 8)
        TB = min(TB, max_tb)
    tn_budget = budget_bytes // max(1, TB * per_elem)
    if cols <= tn_budget:
        TN = cols                                   # full dim (legal even if
    else:                                           #  not a multiple of 128)
        TN = max(128, (tn_budget // 128) * 128)     # lane-dense chunk
    return TB, TN


def transform_forward(x, probability=1.0, key=None, transform_fn=None):
    """Mirrors Transform.forward for a (B, ...) batch.

    transform_fn: optional ELEMENTWISE fn(float32 tile) -> float32 tile.
                  None reproduces the abstract base class (identity).
    probability:  static Python float (branched at trace time, like the
                  reference module's attribute).
    """
    # TODO(synk): Transform.transform() is abstract in the reference module;
    # identity is used when transform_fn is None so subclasses can plug in
    # real elementwise math via `transform_fn`.
    x = jnp.asarray(x)
    out_shape = tuple(x.shape)
    B = x.shape[0]
    N = int(np.prod(x.shape[1:])) if x.ndim > 1 else 1

    # Small-batch sublane packing: (B, N) -> (B*R, N/R), a free reshape.
    R = _repack_rows(B, N)
    rows, cols = B * R, N // R
    x2 = x.reshape(rows, cols)

    in_itemsize = jnp.dtype(x.dtype).itemsize
    budget = _step_budget_bytes()
    TB, TN = _choose_tiles(rows, cols, in_itemsize, budget)
    grid = (pl.cdiv(rows, TB), pl.cdiv(cols, TN))   # column axis is innermost

    # Raise scoped VMEM to cover the double-buffered in+out footprint.
    needed = 2 * TB * TN * (in_itemsize + 4) + 2 * TB * 8 + (1 << 20)
    vmem_limit = min(max(int(needed * 1.25), 20 << 20), 44 << 20)
    cparams = pltpu.CompilerParams(
        dimension_semantics=("parallel", "parallel"),
        vmem_limit_bytes=vmem_limit)

    if transform_fn is None or probability <= 0.0:
        # Identity transform or never-apply: result is float32(x) regardless
        # of the mask -> skip the mask/select, stream a cast+copy.
        out2 = pl.pallas_call(
            _copy_cast_kernel,
            out_shape=jax.ShapeDtypeStruct((rows, cols), jnp.float32),
            grid=grid,
            in_specs=[pl.BlockSpec((TB, TN), lambda i, j: (i, j))],
            out_specs=pl.BlockSpec((TB, TN), lambda i, j: (i, j)),
            compiler_params=cparams,
        )(x2)
    else:
        # Per-sample Bernoulli mask, generated on-device (no host RNG sync).
        if probability >= 1.0:
            mask = jnp.ones((B, 1), jnp.int32)
        else:
            if key is None:
                key = jax.random.PRNGKey(0)
            u = jax.random.uniform(key, (B,), dtype=jnp.float32)
            mask = (probability > u).astype(jnp.int32).reshape(B, 1)
        if R > 1:
            mask = jnp.repeat(mask, R, axis=0)      # per-sample -> per-row

        out2 = pl.pallas_call(
            functools.partial(_masked_transform_kernel,
                              transform_fn=transform_fn),
            out_shape=jax.ShapeDtypeStruct((rows, cols), jnp.float32),
            grid=grid,
            in_specs=[
                pl.BlockSpec((TB, 1), lambda i, j: (i, 0)),   # mask rows
                pl.BlockSpec((TB, TN), lambda i, j: (i, j)),  # data tile
            ],
            out_specs=pl.BlockSpec((TB, TN), lambda i, j: (i, j)),
            compiler_params=cparams,
        )(mask, x2)

    return out2.reshape(out_shape)


if __name__ == "__main__":
    key = jax.random.PRNGKey(0)
    # Small NCHW batch consistent with an image-augmentation transform.
    x = jax.random.normal(key, (2, 4, 16, 16), dtype=jnp.float32)

    # 1) Base-class semantics (abstract/identity transform):
    #    output == float32(input) regardless of the mask.
    out = transform_forward(x, probability=1.0)
    out = jax.block_until_ready(out)
    np.testing.assert_allclose(np.asarray(out),
                               np.asarray(x, dtype=np.float32),
                               rtol=0, atol=0)

    # 2) Per-sample gating with a non-trivial elementwise transform (x -> 2x)
    #    at probability=0.5 (exercises the repacked B<8 sublane-dense path).
    prob = 0.5
    mask_key = jax.random.PRNGKey(1)
    out2 = transform_forward(x, probability=prob, key=mask_key,
                             transform_fn=lambda t: 2.0 * t)
    out2 = jax.block_until_ready(out2)

    u = jax.random.uniform(mask_key, (x.shape[0],), dtype=jnp.float32)
    m = prob > u
    xf = x.astype(jnp.float32)
    ref2 = jnp.where(m[:, None, None, None], 2.0 * xf, xf)
    np.testing.assert_allclose(np.asarray(out2), np.asarray(ref2),
                               rtol=1e-6, atol=1e-6)

    # 3) Non-128-aligned per-sample size (no repack factor exists):
    #    exercises the unpadded full-dim block path.
    x3 = jax.random.normal(jax.random.PRNGKey(2), (4, 3, 10, 10),
                           dtype=jnp.float32)
    out3 = transform_forward(x3, probability=prob, key=mask_key,
                             transform_fn=lambda t: t + 1.0)
    out3 = jax.block_until_ready(out3)
    u3 = jax.random.uniform(mask_key, (x3.shape[0],), dtype=jnp.float32)
    m3 = prob > u3
    x3f = x3.astype(jnp.float32)
    ref3 = jnp.where(m3[:, None, None, None], x3f + 1.0, x3f)
    np.testing.assert_allclose(np.asarray(out3), np.asarray(ref3),
                               rtol=1e-6, atol=1e-6)

    print("KERNEL_OK")
</pallas_src>

<mosaic_0001>
module attributes {stable_mosaic.version = 11 : i64} {
  func.func @_copy_cast_kernel(%arg0: i32, %arg1: i32, %arg2: memref<8x256xf32, #tpu.memory_space<vmem>>, %arg3: memref<8x256xf32, #tpu.memory_space<vmem>>) attributes {dimension_semantics = [#tpu.dimension_semantics<parallel>, #tpu.dimension_semantics<parallel>], iteration_bounds = array<i64: 1, 1>, scalar_prefetch = 0 : i64, scratch_operands = 0 : i64, tpu.core_type = #tpu.core_type<tc>, window_params = [{transform_indices = @transform_0, window_bounds = array<i64: 8, 256>}, {transform_indices = @transform_1, window_bounds = array<i64: 8, 256>}]} {
    %c0 = arith.constant 0 : index
    %c0_0 = arith.constant 0 : index
    %0 = vector.load %arg2[%c0, %c0_0] : memref<8x256xf32, #tpu.memory_space<vmem>>, vector<8x256xf32>
    %c0_1 = arith.constant 0 : index
    %c0_2 = arith.constant 0 : index
    %1 = vector.load %arg3[%c0_1, %c0_2] : memref<8x256xf32, #tpu.memory_space<vmem>>, vector<8x256xf32>
    tpu.vector_store %arg3[%c0_1, %c0_2], %0 {strides = array<i32>} : memref<8x256xf32, #tpu.memory_space<vmem>>, vector<8x256xf32>,
    return
  }
  func.func @transform_0(%arg0: i32, %arg1: i32) -> (i32, i32) {
    %c0_i32 = arith.constant 0 : i32
    return %arg0, %arg1 : i32, i32
  }
  func.func @transform_1(%arg0: i32, %arg1: i32) -> (i32, i32) {
    %c0_i32 = arith.constant 0 : i32
    return %arg0, %arg1 : i32, i32
  }
}

</mosaic_0001>

<bundles_post_ra>
// kernel: tpu_custom_call.1
= control target key start
LH: loop header
LB: loop body
LE: loop exit
PB: predicated region body
PF: predicated region fallthrough
CT: control target
= control target key end

     0   :  { %6 = vsyncpa [#allocation3], 0  ;;  %s104_s0 = inlined_call_operand.hbm [shape: f32[8,256], index: 0, kind: input, shape index: {}]   ;;  %s105_s1 = inlined_call_operand.hbm [shape: f32[8,256], index: 1, kind: output, shape index: {}]  }
   0x1   :  { %7 = vsyncpa [#allocation4], 0  ;;  %s86_s6 = smov [#allocation2]  }
   0x2   :  { %s14_s7 = sshll.u32 %s86_s6, 4  ;;  %s15_s7 = int_to_ptr.vmem [resolvable:$true] %s14_s7 }
   0x3   :  { %s50_s8 = scalar_lea.vmem %s15_s7, 256  ;;  %p55_p1 = scmp.lt.s32.totalorder %s15_s7, %s15_s7 }
   0x4   :  { %p51_p0 = scmp.ne.s32.totalorder %s15_s7, %s50_s8  ;;  %p56_p2 = scmp.lt.s32.totalorder %s50_s8, %s50_s8 }
   0x6   :  { %p57_p3 = por %p56_p2, %p55_p1 }
   0x8   :  { %p58_p4 = pnand %p57_p3, %p51_p0 }
   0xa   :  { %61 = shalt.err (!%p58_p4)
}
   0xb   :  { %17 = dma.hbm_to_vmem [thread:$0]  %s104_s0, 256, %s15_s7, [#allocation3]  }
   0xc   :  { %82 = dma.done.wait [#allocation3], 256  }
   0xd   :  { %83 = vsyncadd [#allocation3], 4294967040  ;;  %s87_s11 = smov [#allocation5]   ;;  %v21_v0 = vld [vmem:[#allocation2] sm:$0xff]  ;;  %v22_v1 = vld [vmem:[#allocation2 + $0x8] sm:$0xff] }
   0xe   :  { %s31_s12 = sshll.u32 %s87_s11, 4  ;;  %23 = vst [vmem:[#allocation5] sm:$0xff] %v21_v0  ;;  %24 = vst [vmem:[#allocation5 + $0x8] sm:$0xff] %v22_v1  ;;  %s32_s12 = int_to_ptr.vmem [resolvable:$true] %s31_s12 }
   0xf   :  { %s62_s13 = scalar_lea.vmem %s32_s12, 256  ;;  %p67_p6 = scmp.lt.s32.totalorder %s32_s12, %s32_s12 }
  0x10   :  { %p63_p5 = scmp.ne.s32.totalorder %s32_s12, %s62_s13  ;;  %p68_p7 = scmp.lt.s32.totalorder %s62_s13, %s62_s13 }
  0x12   :  { %p69_p8 = por %p68_p7, %p67_p6 }
  0x14   :  { %p70_p9 = pnand %p69_p8, %p63_p5 }
  0x16   :  { %73 = shalt.err (!%p70_p9)
}
  0x17   :  { %34 = dma.vmem_to_hbm [thread:$0]  %s32_s12, 256, %s105_s1, [#allocation4]  }
  0x18   :  { %84 = dma.done.wait [#allocation4], 256  }
  0x19   :  { %85 = vsyncadd [#allocation4], 4294967040 }
  0x1a   :  { %38 = vsyncpa [#allocation3], 1 }
  0x1b   :  { %39 = vsyncpa [#allocation4], 1 }

</bundles_post_ra>
